<compile_context>
chip_gen: v6e
topology: v6e:2x2x1
jax: 0.10.0
libtpu: 0.0.40
codegen_flags: <defaults>
</compile_context>

<pallas_src>
import numpy as np
import jax
import jax.numpy as jnp
from jax.experimental import pallas as pl
from jax.experimental.pallas import tpu as pltpu


LANE = 128  # lane-dense padding quantum for both the node and feature dims


def _round_up(x, m):
    return (x + m - 1) // m * m


def _fused_gcn_kernel(a_ref, invdeg_ref, mef_ref, act_ref, x_ref,
                      wn_ref, bn_ref, we_ref, be_ref, out_ref, h_ref):
    """One grid step == one EdgeGraphConv layer; h_ref carries the activation."""
    layer = pl.program_id(0)

    @pl.when(layer == 0)
    def _load_input():
        h_ref[...] = x_ref[...]

    # node_fc for this layer: [N_pad, F] @ [F, F] + bias (bias rows on padded
    # nodes are harmless -- A has zero columns there, see module docstring).
    hn = (jnp.dot(h_ref[...], wn_ref[...], preferred_element_type=jnp.float32)
          + bn_ref[...])

    # Neighbourhood sum of the node term via the dense adjacency-count matrix.
    agg = jnp.dot(a_ref[...], hn, preferred_element_type=jnp.float32)

    # Mean aggregation + hoisted rank-1 edge_fc contribution:
    #   mean_e he = mean_ef * we + active * be   (active = 1 iff in-degree > 0)
    h_new = (agg * invdeg_ref[...]
             + mef_ref[...] * we_ref[...]
             + act_ref[...] * be_ref[...])
    h_ref[...] = h_new

    @pl.when(layer == pl.num_programs(0) - 1)
    def _finalize():
        out_ref[...] = h_new


def simple_gcn_forward_pallas(node_feat, edge_feat, src, dst, layer_params):
    """Full SimpleGCNWithEdges forward (self-loops + chained layers), one
    pallas_call.  layer_params: list of (wn [fi,fo], bn [fo], we [1,fo], be [fo])."""
    N, in_feats = node_feat.shape
    out_feats = layer_params[-1][0].shape[1]
    num_layers = len(layer_params)

    # dgl.add_self_loop: append one self-loop per node with zero edge features.
    loops = jnp.arange(N, dtype=jnp.int32)
    src_f = jnp.concatenate([src.astype(jnp.int32), loops])
    dst_f = jnp.concatenate([dst.astype(jnp.int32), loops])
    ef_f = jnp.concatenate(
        [edge_feat[:, 0].astype(jnp.float32), jnp.zeros((N,), jnp.float32)])

    n_pad = _round_up(N, LANE)
    f_pad = _round_up(max([in_feats]
                          + [wn.shape[1] for (wn, _, _, _) in layer_params]), LANE)

    # Per-node aggregates (pure JAX, O(E), shared by every layer).
    ones_e = jnp.ones_like(src_f, dtype=jnp.float32)
    deg = jax.ops.segment_sum(ones_e, dst_f, num_segments=N)
    inv_deg = jnp.where(deg > 0, 1.0 / jnp.maximum(deg, 1.0), 0.0)
    sum_ef = jax.ops.segment_sum(ef_f, dst_f, num_segments=N)
    mean_ef = jnp.where(deg > 0, sum_ef / jnp.maximum(deg, 1.0), 0.0)
    active = (deg > 0).astype(jnp.float32)

    # Dense adjacency counts A[v, u] = #edges u -> v (padded rows/cols all zero).
    flat_idx = dst_f * n_pad + src_f
    adj = jax.ops.segment_sum(ones_e, flat_idx,
                              num_segments=n_pad * n_pad).reshape(n_pad, n_pad)

    # Pad per-node vectors / input features.
    invdeg_p = jnp.zeros((n_pad, 1), jnp.float32).at[:N, 0].set(inv_deg)
    mef_p = jnp.zeros((n_pad, 1), jnp.float32).at[:N, 0].set(mean_ef)
    act_p = jnp.zeros((n_pad, 1), jnp.float32).at[:N, 0].set(active)
    x_p = jnp.zeros((n_pad, f_pad), jnp.float32).at[:N, :in_feats].set(
        node_feat.astype(jnp.float32))

    # Stack + zero-pad all layer weights to a common [f_pad, f_pad] footprint.
    wn_s = jnp.zeros((num_layers, f_pad, f_pad), jnp.float32)
    bn_s = jnp.zeros((num_layers, 1, f_pad), jnp.float32)
    we_s = jnp.zeros((num_layers, 1, f_pad), jnp.float32)
    be_s = jnp.zeros((num_layers, 1, f_pad), jnp.float32)
    for i, (wn, bn, we, be) in enumerate(layer_params):
        fi, fo = wn.shape
        wn_s = wn_s.at[i, :fi, :fo].set(wn)
        bn_s = bn_s.at[i, 0, :fo].set(bn)
        we_s = we_s.at[i, 0, :fo].set(we[0])
        be_s = be_s.at[i, 0, :fo].set(be)

    out = pl.pallas_call(
        _fused_gcn_kernel,
        out_shape=jax.ShapeDtypeStruct((n_pad, f_pad), jnp.float32),
        grid=(num_layers,),
        in_specs=[
            pl.BlockSpec((n_pad, n_pad), lambda l: (0, 0)),           # adjacency
            pl.BlockSpec((n_pad, 1), lambda l: (0, 0)),               # inv_deg
            pl.BlockSpec((n_pad, 1), lambda l: (0, 0)),               # mean_ef
            pl.BlockSpec((n_pad, 1), lambda l: (0, 0)),               # active
            pl.BlockSpec((n_pad, f_pad), lambda l: (0, 0)),           # x
            pl.BlockSpec((None, f_pad, f_pad), lambda l: (l, 0, 0)),  # Wn[l]
            pl.BlockSpec((None, 1, f_pad), lambda l: (l, 0, 0)),      # bn[l]
            pl.BlockSpec((None, 1, f_pad), lambda l: (l, 0, 0)),      # we[l]
            pl.BlockSpec((None, 1, f_pad), lambda l: (l, 0, 0)),      # be[l]
        ],
        out_specs=pl.BlockSpec((n_pad, f_pad), lambda l: (0, 0)),
        scratch_shapes=[pltpu.VMEM((n_pad, f_pad), jnp.float32)],     # resident h
        compiler_params=pltpu.CompilerParams(
            dimension_semantics=("arbitrary",),
            vmem_limit_bytes=64 * 1024 * 1024),
    )(adj, invdeg_p, mef_p, act_p, x_p, wn_s, bn_s, we_s, be_s)

    return out[:N, :out_feats]


def simple_gcn_forward_ref(node_feat, edge_feat, src, dst, layer_params):
    """Pure-JAX reference with the same math as the PyTorch/DGL module."""
    N = node_feat.shape[0]
    loops = jnp.arange(N, dtype=jnp.int32)
    src_f = jnp.concatenate([src.astype(jnp.int32), loops])
    dst_f = jnp.concatenate([dst.astype(jnp.int32), loops])
    ef_f = jnp.concatenate(
        [edge_feat, jnp.zeros((N, edge_feat.shape[1]), edge_feat.dtype)], axis=0)
    deg = jax.ops.segment_sum(jnp.ones_like(src_f, dtype=jnp.float32), dst_f,
                              num_segments=N)
    h = node_feat
    for (wn, bn, we, be) in layer_params:
        hn = h @ wn + bn
        he = ef_f @ we + be
        m = hn[src_f] + he
        agg = jax.ops.segment_sum(m, dst_f, num_segments=N)
        h = jnp.where(deg[:, None] > 0, agg / jnp.maximum(deg, 1.0)[:, None], 0.0)
    return h


def init_linear(key, fan_in, fan_out):
    # Deterministic stand-in for nn.Linear.reset_parameters (uniform +/- 1/sqrt(fan_in)).
    kw, kb = jax.random.split(key)
    bound = 1.0 / np.sqrt(fan_in)
    w = jax.random.uniform(kw, (fan_in, fan_out), jnp.float32, -bound, bound)
    b = jax.random.uniform(kb, (fan_out,), jnp.float32, -bound, bound)
    return w, b


if __name__ == "__main__":
    key = jax.random.PRNGKey(0)
    k_x, k_ef, k_src, k_dst, k_p = jax.random.split(key, 5)

    # Small synthetic graph / model (num_layers = 3: in->hidden->hidden->out).
    N = 16            # nodes
    E = 150           # edges (self-loops added inside the forward)
    in_feats, hidden, out_feats, num_layers = 16, 32, 24, 3

    node_feat = jax.random.normal(k_x, (N, in_feats), jnp.float32)
    edge_feat = jax.random.normal(k_ef, (E, 1), jnp.float32)
    src = jax.random.randint(k_src, (E,), 0, N, jnp.int32)
    dst = jax.random.randint(k_dst, (E,), 0, N, jnp.int32)

    dims = ([(in_feats, hidden)]
            + [(hidden, hidden)] * (num_layers - 2)
            + [(hidden, out_feats)])
    layer_params = []
    for k, (fi, fo) in zip(jax.random.split(k_p, num_layers), dims):
        kn, ke = jax.random.split(k)
        wn, bn = init_linear(kn, fi, fo)
        we, be = init_linear(ke, 1, fo)
        layer_params.append((wn, bn, we, be))

    out = simple_gcn_forward_pallas(node_feat, edge_feat, src, dst, layer_params)
    out = jax.block_until_ready(out)

    ref = simple_gcn_forward_ref(node_feat, edge_feat, src, dst, layer_params)

    np.testing.assert_allclose(np.asarray(out), np.asarray(ref),
                               rtol=1e-4, atol=1e-4)
    print("KERNEL_OK")
</pallas_src>

<mosaic_0001>
module attributes {stable_mosaic.version = 11 : i64} {
  func.func @_fused_gcn_kernel(%arg0: i32, %arg1: memref<128x128xf32, #tpu.memory_space<vmem>>, %arg2: memref<128x1xf32, #tpu.memory_space<vmem>>, %arg3: memref<128x1xf32, #tpu.memory_space<vmem>>, %arg4: memref<128x1xf32, #tpu.memory_space<vmem>>, %arg5: memref<128x128xf32, #tpu.memory_space<vmem>>, %arg6: memref<1x128x128xf32, #tpu.memory_space<vmem>>, %arg7: memref<1x1x128xf32, #tpu.memory_space<vmem>>, %arg8: memref<1x1x128xf32, #tpu.memory_space<vmem>>, %arg9: memref<1x1x128xf32, #tpu.memory_space<vmem>>, %arg10: memref<128x128xf32, #tpu.memory_space<vmem>>, %arg11: memref<128x128xf32, #tpu.memory_space<vmem>>) attributes {dimension_semantics = [#tpu.dimension_semantics<arbitrary>], iteration_bounds = array<i64: 3>, scalar_prefetch = 0 : i64, scratch_operands = 1 : i64, tpu.core_type = #tpu.core_type<tc>, window_params = [{pipeline_mode = #tpu.pipeline_mode<synchronous>, transform_indices = @transform_0, window_bounds = array<i64: 128, 128>}, {pipeline_mode = #tpu.pipeline_mode<synchronous>, transform_indices = @transform_1, window_bounds = array<i64: 128, 1>}, {pipeline_mode = #tpu.pipeline_mode<synchronous>, transform_indices = @transform_2, window_bounds = array<i64: 128, 1>}, {pipeline_mode = #tpu.pipeline_mode<synchronous>, transform_indices = @transform_3, window_bounds = array<i64: 128, 1>}, {pipeline_mode = #tpu.pipeline_mode<synchronous>, transform_indices = @transform_4, window_bounds = array<i64: 128, 128>}, {transform_indices = @transform_5, window_bounds = array<i64: 1, 128, 128>}, {transform_indices = @transform_6, window_bounds = array<i64: 1, 1, 128>}, {transform_indices = @transform_7, window_bounds = array<i64: 1, 1, 128>}, {transform_indices = @transform_8, window_bounds = array<i64: 1, 1, 128>}, {pipeline_mode = #tpu.pipeline_mode<synchronous>, transform_indices = @transform_9, window_bounds = array<i64: 128, 128>}]} {
    %c0_i32 = arith.constant 0 : i32
    %0 = arith.cmpi eq, %arg0, %c0_i32 : i32
    %1 = arith.extui %0 : i1 to i32
    %c0_i32_0 = arith.constant 0 : i32
    %2 = arith.cmpi ne, %1, %c0_i32_0 : i32
    scf.if %2 {
      %c0_26 = arith.constant 0 : index
      %c0_27 = arith.constant 0 : index
      %34 = vector.load %arg5[%c0_26, %c0_27] : memref<128x128xf32, #tpu.memory_space<vmem>>, vector<128x128xf32>
      %c0_28 = arith.constant 0 : index
      %c0_29 = arith.constant 0 : index
      %35 = vector.load %arg11[%c0_28, %c0_29] : memref<128x128xf32, #tpu.memory_space<vmem>>, vector<128x128xf32>
      tpu.vector_store %arg11[%c0_28, %c0_29], %34 {strides = array<i32>} : memref<128x128xf32, #tpu.memory_space<vmem>>, vector<128x128xf32>,
    } else {
    }
    %c0 = arith.constant 0 : index
    %c0_1 = arith.constant 0 : index
    %3 = vector.load %arg11[%c0, %c0_1] : memref<128x128xf32, #tpu.memory_space<vmem>>, vector<128x128xf32>
    %c0_2 = arith.constant 0 : index
    %c0_3 = arith.constant 0 : index
    %c0_4 = arith.constant 0 : index
    %4 = vector.load %arg6[%c0_2, %c0_3, %c0_4] : memref<1x128x128xf32, #tpu.memory_space<vmem>>, vector<1x128x128xf32>
    %5 = vector.shape_cast %4 : vector<1x128x128xf32> to vector<128x128xf32>
    %cst = arith.constant dense<0.000000e+00> : vector<128x128xf32>
    %6 = tpu.matmul %3, %5, %cst {dimension_numbers = #tpu.dot_dimension_numbers<[1], [0], [0], [1], [0, 0, 1, 1], [], []>} : vector<128x128xf32>, vector<128x128xf32>, vector<128x128xf32> -> vector<128x128xf32>
    %c0_5 = arith.constant 0 : index
    %c0_6 = arith.constant 0 : index
    %c0_7 = arith.constant 0 : index
    %7 = vector.load %arg7[%c0_5, %c0_6, %c0_7] : memref<1x1x128xf32, #tpu.memory_space<vmem>>, vector<1x1x128xf32>
    %8 = vector.shape_cast %7 : vector<1x1x128xf32> to vector<1x128xf32>
    %9 = vector.broadcast %8 : vector<1x128xf32> to vector<128x128xf32>
    %10 = arith.addf %6, %9 : vector<128x128xf32>
    %c0_8 = arith.constant 0 : index
    %c0_9 = arith.constant 0 : index
    %11 = vector.load %arg1[%c0_8, %c0_9] : memref<128x128xf32, #tpu.memory_space<vmem>>, vector<128x128xf32>
    %cst_10 = arith.constant dense<0.000000e+00> : vector<128x128xf32>
    %12 = tpu.matmul %11, %10, %cst_10 {dimension_numbers = #tpu.dot_dimension_numbers<[1], [0], [0], [1], [0, 0, 1, 1], [], []>} : vector<128x128xf32>, vector<128x128xf32>, vector<128x128xf32> -> vector<128x128xf32>
    %c0_11 = arith.constant 0 : index
    %c0_12 = arith.constant 0 : index
    %13 = vector.load %arg2[%c0_11, %c0_12] : memref<128x1xf32, #tpu.memory_space<vmem>>, vector<128x1xf32>
    %14 = vector.broadcast %13 : vector<128x1xf32> to vector<128x128xf32>
    %15 = arith.mulf %12, %14 : vector<128x128xf32>
    %c0_13 = arith.constant 0 : index
    %c0_14 = arith.constant 0 : index
    %16 = vector.load %arg3[%c0_13, %c0_14] : memref<128x1xf32, #tpu.memory_space<vmem>>, vector<128x1xf32>
    %c0_15 = arith.constant 0 : index
    %c0_16 = arith.constant 0 : index
    %c0_17 = arith.constant 0 : index
    %17 = vector.load %arg8[%c0_15, %c0_16, %c0_17] : memref<1x1x128xf32, #tpu.memory_space<vmem>>, vector<1x1x128xf32>
    %18 = vector.shape_cast %17 : vector<1x1x128xf32> to vector<1x128xf32>
    %19 = vector.broadcast %16 : vector<128x1xf32> to vector<128x128xf32>
    %20 = vector.broadcast %18 : vector<1x128xf32> to vector<128x128xf32>
    %21 = arith.mulf %19, %20 : vector<128x128xf32>
    %22 = arith.addf %15, %21 : vector<128x128xf32>
    %c0_18 = arith.constant 0 : index
    %c0_19 = arith.constant 0 : index
    %23 = vector.load %arg4[%c0_18, %c0_19] : memref<128x1xf32, #tpu.memory_space<vmem>>, vector<128x1xf32>
    %c0_20 = arith.constant 0 : index
    %c0_21 = arith.constant 0 : index
    %c0_22 = arith.constant 0 : index
    %24 = vector.load %arg9[%c0_20, %c0_21, %c0_22] : memref<1x1x128xf32, #tpu.memory_space<vmem>>, vector<1x1x128xf32>
    %25 = vector.shape_cast %24 : vector<1x1x128xf32> to vector<1x128xf32>
    %26 = vector.broadcast %23 : vector<128x1xf32> to vector<128x128xf32>
    %27 = vector.broadcast %25 : vector<1x128xf32> to vector<128x128xf32>
    %28 = arith.mulf %26, %27 : vector<128x128xf32>
    %29 = arith.addf %22, %28 : vector<128x128xf32>
    %c0_23 = arith.constant 0 : index
    %c0_24 = arith.constant 0 : index
    %30 = vector.load %arg11[%c0_23, %c0_24] : memref<128x128xf32, #tpu.memory_space<vmem>>, vector<128x128xf32>
    tpu.vector_store %arg11[%c0_23, %c0_24], %29 {strides = array<i32>} : memref<128x128xf32, #tpu.memory_space<vmem>>, vector<128x128xf32>,
    %c2_i32 = arith.constant 2 : i32
    %31 = arith.cmpi eq, %arg0, %c2_i32 : i32
    %32 = arith.extui %31 : i1 to i32
    %c0_i32_25 = arith.constant 0 : i32
    %33 = arith.cmpi ne, %32, %c0_i32_25 : i32
    scf.if %33 {
      %c0_26 = arith.constant 0 : index
      %c0_27 = arith.constant 0 : index
      %34 = vector.load %arg10[%c0_26, %c0_27] : memref<128x128xf32, #tpu.memory_space<vmem>>, vector<128x128xf32>
      tpu.vector_store %arg10[%c0_26, %c0_27], %29 {strides = array<i32>} : memref<128x128xf32, #tpu.memory_space<vmem>>, vector<128x128xf32>,
    } else {
    }
    return
  }
  func.func @transform_0(%arg0: i32) -> (i32, i32) {
    %c0_i32 = arith.constant 0 : i32
    %c0_i32_0 = arith.constant 0 : i32
    %c0_i32_1 = arith.constant 0 : i32
    return %c0_i32, %c0_i32_0 : i32, i32
  }
  func.func @transform_1(%arg0: i32) -> (i32, i32) {
    %c0_i32 = arith.constant 0 : i32
    %c0_i32_0 = arith.constant 0 : i32
    %c0_i32_1 = arith.constant 0 : i32
    return %c0_i32, %c0_i32_0 : i32, i32
  }
  func.func @transform_2(%arg0: i32) -> (i32, i32) {
    %c0_i32 = arith.constant 0 : i32
    %c0_i32_0 = arith.constant 0 : i32
    %c0_i32_1 = arith.constant 0 : i32
    return %c0_i32, %c0_i32_0 : i32, i32
  }
  func.func @transform_3(%arg0: i32) -> (i32, i32) {
    %c0_i32 = arith.constant 0 : i32
    %c0_i32_0 = arith.constant 0 : i32
    %c0_i32_1 = arith.constant 0 : i32
    return %c0_i32, %c0_i32_0 : i32, i32
  }
  func.func @transform_4(%arg0: i32) -> (i32, i32) {
    %c0_i32 = arith.constant 0 : i32
    %c0_i32_0 = arith.constant 0 : i32
    %c0_i32_1 = arith.constant 0 : i32
    return %c0_i32, %c0_i32_0 : i32, i32
  }
  func.func @transform_5(%arg0: i32) -> (i32, i32, i32) {
    %c0_i32 = arith.constant 0 : i32
    %c0_i32_0 = arith.constant 0 : i32
    %c0_i32_1 = arith.constant 0 : i32
    return %arg0, %c0_i32, %c0_i32_0 : i32, i32, i32
  }
  func.func @transform_6(%arg0: i32) -> (i32, i32, i32) {
    %c0_i32 = arith.constant 0 : i32
    %c0_i32_0 = arith.constant 0 : i32
    %c0_i32_1 = arith.constant 0 : i32
    return %arg0, %c0_i32, %c0_i32_0 : i32, i32, i32
  }
  func.func @transform_7(%arg0: i32) -> (i32, i32, i32) {
    %c0_i32 = arith.constant 0 : i32
    %c0_i32_0 = arith.constant 0 : i32
    %c0_i32_1 = arith.constant 0 : i32
    return %arg0, %c0_i32, %c0_i32_0 : i32, i32, i32
  }
  func.func @transform_8(%arg0: i32) -> (i32, i32, i32) {
    %c0_i32 = arith.constant 0 : i32
    %c0_i32_0 = arith.constant 0 : i32
    %c0_i32_1 = arith.constant 0 : i32
    return %arg0, %c0_i32, %c0_i32_0 : i32, i32, i32
  }
  func.func @transform_9(%arg0: i32) -> (i32, i32) {
    %c0_i32 = arith.constant 0 : i32
    %c0_i32_0 = arith.constant 0 : i32
    %c0_i32_1 = arith.constant 0 : i32
    return %c0_i32, %c0_i32_0 : i32, i32
  }
}

</mosaic_0001>

<bundles_post_ra>
// kernel: tpu_custom_call.1
= control target key start
LH: loop header
LB: loop body
LE: loop exit
PB: predicated region body
PF: predicated region fallthrough
CT: control target
= control target key end

     0   :  { %14 = vsyncpa [#allocation4], 0  ;;  %s2078_s0 = inlined_call_operand.hbm [shape: f32[128,128], index: 0, kind: input, shape index: {}]   ;;  %s2079_s1 = inlined_call_operand.vmem [shape: f32[128,1], index: 1, kind: input, shape index: {}]   ;;  %s2080_s2 = inlined_call_operand.vmem [shape: f32[128,1], index: 2, kind: input, shape index: {}]   ;;  %s2081_s3 = inlined_call_operand.vmem [shape: f32[128,1], index: 3, kind: input, shape index: {}]   ;;  %s2082_s4 = inlined_call_operand.hbm [shape: f32[128,128], index: 4, kind: input, shape index: {}]   ;;  %s2083_s5 = inlined_call_operand.vmem [shape: f32[3,128,128], index: 5, kind: input, shape index: {}]   ;;  %s2084_s6 = inlined_call_operand.vmem [shape: f32[3,1,128], index: 6, kind: input, shape index: {}]   ;;  %s2085_s7 = inlined_call_operand.vmem [shape: f32[3,1,128], index: 7, kind: input, shape index: {}]   ;;  %s2086_s8 = inlined_call_operand.vmem [shape: f32[3,1,128], index: 8, kind: input, shape index: {}]   ;;  %s2087_s9 = inlined_call_operand.hbm [shape: f32[128,128], index: 9, kind: output, shape index: {}]  }
   0x1   :  { %15 = vsyncpa [#allocation7], 0 }
   0x2   :  { %16 = vsyncpa [#allocation5], 0  ;;  %s1680_s30 = smov 0  }
   0x3 LB: > { %s1686_s10 = sadd.s32 4294967295, %s1620_s30   ;;  %p1288_p0 = scmp.ge.s32.totalorder %s1620_s30, 1  ;;  %s1620_s30 = sphi %s1680_s30, %s22_s30  }
   0x4   : > { %p257_p1 = scmp.lt.s32.totalorder %s1620_s30, 4  ;;  %s1622_s11 = smov [#allocation3]  }
   0x5   : > { %s269_s12 = sshll.u32 %s1622_s11, 4  ;;  %p1502_p4 = scmp.eq.s32.totalorder %s1686_s10, 0  ;;  %s270_s12 = int_to_ptr.vmem [resolvable:$true] %s269_s12 }
   0x6   : > { %p1691_p3 = pnand %p1288_p0, %p257_p1  ;;  %s1623_s14 = smov [#allocation6]  }
   0x7   : > { %s291_s15 = sshll.u32 %s1623_s14, 4  ;;  %s1537_s17 = scalar_lea.vmem %s270_s12, 2048  ;;  %s292_s15 = int_to_ptr.vmem [resolvable:$true] %s291_s15 }
   0x8   : > { %p1495_p5 = pneg %p1691_p3  ;;  %p1538_p8 = scmp.ne.s32.totalorder %s270_s12, %s1537_s17 }
   0x9   : > { %p1545_p11 = scmp.lt.s32.totalorder %s270_s12, %s270_s12  ;;  %p1546_p12 = scmp.lt.s32.totalorder %s1537_s17, %s1537_s17 }
   0xa   : > { %p1700_p6 = pnand %p1502_p4, %p1495_p5 }
   0xb   : > { %p1547_p13 = por %p1546_p12, %p1545_p11 }
   0xc   : > { %p1528_p7 = pneg %p1700_p6 }
   0xe   : > { %p1540_p9 = pnand %p1538_p8, %p1528_p7 }
  0x10   : > { %p1541_p10 = pneg %p1540_p9 }
  0x12   : > { %p1548_p0 = pnand %p1547_p13, %p1541_p10 }
  0x14   : > { %1551 = shalt.err (!%p1548_p0)
}
  0x15   : > { %s1624_s18 = smov 128   ;;  %s1625_s19 = smov 8  }
  0x16   : > { %1498 = dma.hbm_to_vmem [thread:$0]  (!%p1700_p6), %s2078_s0, 2048, %s270_s12, [#allocation4], %s1624_s18, %s1624_s18, %s1625_s19  }
  0x17   : > { %s1563_s22 = scalar_lea.vmem %s292_s15, 2048  ;;  %p1571_p9 = scmp.lt.s32.totalorder %s292_s15, %s292_s15 }
  0x18   : > { %p1564_p1 = scmp.ne.s32.totalorder %s292_s15, %s1563_s22  ;;  %p1572_p2 = scmp.lt.s32.totalorder %s1563_s22, %s1563_s22 }
  0x1a   : > { %p1566_p5 = pnand %p1564_p1, %p1528_p7  ;;  %p1573_p11 = por %p1572_p2, %p1571_p9 }
  0x1c   : > { %p1567_p8 = pneg %p1566_p5 }
  0x1e   : > { %p1574_p10 = pnand %p1573_p11, %p1567_p8 }
  0x20   : > { %1577 = shalt.err (!%p1574_p10)
}
  0x21   : > { %1501 = dma.hbm_to_vmem [thread:$0]  (!%p1700_p6), %s2082_s4, 2048, %s292_s15, [#allocation7], %s1624_s18, %s1624_s18, %s1625_s19  }
  0x22   : > { %333 = sbr.rel (%p1691_p3) target bundleno = 601 (0x259), region = 56 }
  0x27   : > { %1607 = dma.done.wait (%p1502_p4), [#allocation4], 2048  }
  0x28   : > { %1609 = vsyncadd (%p1502_p4), [#allocation4], 4294965248 }
  0x29   : > { %1611 = dma.done.wait (%p1502_p4), [#allocation7], 2048  }
  0x2a   : > { %1613 = vsyncadd (%p1502_p4), [#allocation7], 4294965248  ;;  %p377_p2 = scmp.lt.s32.totalorder %s1686_s10, 2  ;;  %p2090_p3 = scmp.ne.s32.totalorder %s1686_s10, 0 }
  0x2c   : > { %s1734_s25 = scalar_select %p377_p2, %s1686_s10, 2 }
  0x2d   : > { %394 = sbr.rel (%p2090_p3) target bundleno = 59 (0x3b), region = 68 }
  0x2e   : > { %s1306_s26 = sshll.u32 %s1734_s25, 7  ;;  %s384_s29 = scalar_lea.vmem %s2084_s6, %s1734_s25 }
  0x2f   : > { %s1744_s13 = scalar_lea.vmem %s2083_s5, %s1306_s26  ;;  %s387_s16 = scalar_lea.vmem %s2085_s7, %s1734_s25 }
  0x30   : > { %s390_s19 = scalar_lea.vmem %s2086_s8, %s1734_s25 }
  0x32   : > { %v395_v0 = vld [vmem:[#allocation6] sm:$0xff]  ;;  %v396_v1 = vld [vmem:[#allocation6 + $0x8] sm:$0xff]  ;;  %v397_v2 = vld [vmem:[#allocation6 + $0x10] sm:$0xff] }
  0x33   : > { %411 = vst [vmem:[#allocation2 + $0x30] sm:$0xff] %v395_v0  ;;  %412 = vst [vmem:[#allocation2] sm:$0xff] %v396_v1  ;;  %v398_v3 = vld [vmem:[#allocation6 + $0x18] sm:$0xff]  ;;  %v399_v4 = vld [vmem:[#allocation6 + $0x20] sm:$0xff] }
  0x34   : > { %413 = vst [vmem:[#allocation2 + $0x58] sm:$0xff] %v397_v2  ;;  %v400_v5 = vld [vmem:[#allocation6 + $0x28] sm:$0xff]  ;;  %414 = vst [vmem:[#allocation2 + $0x18] sm:$0xff] %v398_v3  ;;  %v401_v6 = vld [vmem:[#allocation6 + $0x30] sm:$0xff] }
  0x35   : > { %415 = vst [vmem:[#allocation2 + $0x50] sm:$0xff] %v399_v4  ;;  %416 = vst [vmem:[#allocation2 + $0x68] sm:$0xff] %v400_v5  ;;  %v402_v7 = vld [vmem:[#allocation6 + $0x38] sm:$0xff]  ;;  %v403_v8 = vld [vmem:[#allocation6 + $0x40] sm:$0xff] }
  0x36   : > { %417 = vst [vmem:[#allocation2 + $0x8] sm:$0xff] %v401_v6  ;;  %418 = vst [vmem:[#allocation2 + $0x48] sm:$0xff] %v402_v7  ;;  %v404_v9 = vld [vmem:[#allocation6 + $0x48] sm:$0xff]  ;;  %v405_v10 = vld [vmem:[#allocation6 + $0x50] sm:$0xff] }
  0x37   : > { %419 = vst [vmem:[#allocation2 + $0x40] sm:$0xff] %v403_v8  ;;  %v406_v11 = vld [vmem:[#allocation6 + $0x58] sm:$0xff]  ;;  %420 = vst [vmem:[#allocation2 + $0x20] sm:$0xff] %v404_v9  ;;  %v407_v12 = vld [vmem:[#allocation6 + $0x60] sm:$0xff] }
  0x38   : > { %421 = vst [vmem:[#allocation2 + $0x10] sm:$0xff] %v405_v10  ;;  %422 = vst [vmem:[#allocation2 + $0x38] sm:$0xff] %v406_v11  ;;  %v408_v13 = vld [vmem:[#allocation6 + $0x68] sm:$0xff]  ;;  %v409_v14 = vld [vmem:[#allocation6 + $0x70] sm:$0xff] }
  0x39   : > { %423 = vst [vmem:[#allocation2 + $0x60] sm:$0xff] %v407_v12  ;;  %424 = vst [vmem:[#allocation2 + $0x70] sm:$0xff] %v408_v13  ;;  %v410_v15 = vld [vmem:[#allocation6 + $0x78] sm:$0xff] }
  0x3a   : > { %425 = vst [vmem:[#allocation2 + $0x78] sm:$0xff] %v409_v14  ;;  %426 = vst [vmem:[#allocation2 + $0x28] sm:$0xff] %v410_v15 }
  0x3b PF: > { %v458_v16 = vld [vmem:[%s1744_s13 + $0x78] sm:$0xff]  ;;  %v457_v17 = vld [vmem:[%s1744_s13 + $0x70] sm:$0xff]  ;;  %v1626_v18 = vmov 0   ;;  %v456_v19 = vld [vmem:[%s1744_s13 + $0x68] sm:$0xff]  ;;  %p1301_p4 = scmp.ne.s32.totalorder %s1686_s10, 2 }
  0x3c   : > { %1371 = vmatprep.subr.mxu0 %v458_v16  ;;  %1525 = vset.pattern.permute.xlu1 %v1626_v18  ;;  %v455_v20 = vld [vmem:[%s1744_s13 + $0x60] sm:$0xff]  ;;  %v427_v21 = vld [vmem:[#allocation2 + $0x30] sm:$0xff]  ;;  %v454_v22 = vld [vmem:[%s1744_s13 + $0x58] sm:$0xff] }
  0x3d   : > { %1372 = vmatpush3.msra.mxu0 %v458_v16  ;;  %1524 = vset.pattern.permute.xlu0 %v1626_v18  ;;  %v453_v23 = vld [vmem:[%s1744_s13 + $0x50] sm:$0xff]  ;;  %v452_v24 = vld [vmem:[%s1744_s13 + $0x48] sm:$0xff]  ;;  %v772_v26 = vld [vmem:[%s2079_s1] sm:$0xff] }
  0x3e   : > { %1373 = vmatprep.subr.mxu0 %v457_v17  ;;  %1403 = vmatprep.mubr.f32.mxu0 %v427_v21  ;;  %v774_v25 = vld [vmem:[%s2079_s1 + $0x10] sm:$0xff]  ;;  %v451_v27 = vld [vmem:[%s1744_s13 + $0x40] sm:$0xff]  ;;  %v775_v28 = vld [vmem:[%s2079_s1 + $0x18] sm:$0xff] }
  0x3f   : > { %1374 = vmatpush3.msra.mxu0 %v457_v17  ;;  %800 = vperm.xlu1 %1525, %v774_v25   ;;  %v773_v29 = vld [vmem:[%s2079_s1 + $0x8] sm:$0xff]  ;;  %v450_v30 = vld [vmem:[%s1744_s13 + $0x38] sm:$0xff]  ;;  %v449_v31 = vld [vmem:[%s1744_s13 + $0x30] sm:$0xff] }
  0x40   : > { %1375 = vmatprep.subr.mxu0 %v456_v19  ;;  %790 = vperm.xlu0 %1524, %v772_v26   ;;  %v777_v32 = vld [vmem:[%s2079_s1 + $0x28] sm:$0xff]  ;;  %v776_v33 = vld [vmem:[%s2079_s1 + $0x20] sm:$0xff]  ;;  %v779_v36 = vld [vmem:[%s2079_s1 + $0x38] sm:$0xff] }
  0x41   : > { %1376 = vmatpush3.msra.mxu0 %v456_v19  ;;  %v448_v34 = vld [vmem:[%s1744_s13 + $0x28] sm:$0xff]  ;;  %v447_v35 = vld [vmem:[%s1744_s13 + $0x20] sm:$0xff]  ;;  %v778_v37 = vld [vmem:[%s2079_s1 + $0x30] sm:$0xff] }
  0x42   : > { %1377 = vmatprep.subr.mxu0 %v455_v20  ;;  %v446_v38 = vld [vmem:[%s1744_s13 + $0x18] sm:$0xff]  ;;  %v445_v39 = vld [vmem:[%s1744_s13 + $0x10] sm:$0xff]  ;;  %v781_v40 = vld [vmem:[%s2079_s1 + $0x48] sm:$0xff] }
  0x43   : > { %1378 = vmatpush3.msra.mxu0 %v455_v20  ;;  %805 = vperm.xlu1 %1525, %v775_v28   ;;  %v780_v41 = vld [vmem:[%s2079_s1 + $0x40] sm:$0xff]  ;;  %v444_v42 = vld [vmem:[%s1744_s13 + $0x8] sm:$0xff]  ;;  %v783_v44 = vld [vmem:[%s2079_s1 + $0x58] sm:$0xff] }
  0x44   : > { %1379 = vmatprep.subr.mxu0 %v454_v22  ;;  %795 = vperm.xlu0 %1524, %v773_v29   ;;  %v443_v43 = vld [vmem:[%s1744_s13] sm:$0xff]  ;;  %v782_v45 = vld [vmem:[%s2079_s1 + $0x50] sm:$0xff]  ;;  %v429_v47 = vld [vmem:[#allocation2 + $0x58] sm:$0xff] }
  0x45   : > { %1380 = vmatpush3.msra.mxu0 %v454_v22  ;;  %v428_v46 = vld [vmem:[#allocation2] sm:$0xff]  ;;  %v430_v48 = vld [vmem:[#allocation2 + $0x18] sm:$0xff]  ;;  %v431_v49 = vld [vmem:[#allocation2 + $0x50] sm:$0xff] }
  0x46   : > { %1381 = vmatprep.subr.mxu0 %v453_v23  ;;  %v432_v50 = vld [vmem:[#allocation2 + $0x68] sm:$0xff]  ;;  %v435_v53 = vld [vmem:[#allocation2 + $0x40] sm:$0xff]  ;;  %v437_v55 = vld [vmem:[#allocation2 + $0x10] sm:$0xff] }
  0x47   : > { %1382 = vmatpush3.msra.mxu0 %v453_v23  ;;  %815 = vperm.xlu1 %1525, %v777_v32   ;;  %v433_v51 = vld [vmem:[#allocation2 + $0x8] sm:$0xff]  ;;  %v436_v54 = vld [vmem:[#allocation2 + $0x20] sm:$0xff]  ;;  %v438_v56 = vld [vmem:[#allocation2 + $0x38] sm:$0xff] }
  0x48   : > { %1383 = vmatprep.subr.mxu0 %v452_v24  ;;  %810 = vperm.xlu0 %1524, %v776_v33   ;;  %v434_v52 = vld [vmem:[#allocation2 + $0x48] sm:$0xff]  ;;  %v439_v57 = vld [vmem:[#allocation2 + $0x60] sm:$0xff]  ;;  %v440_v58 = vld [vmem:[#allocation2 + $0x70] sm:$0xff] }
  0x49   : > { %1384 = vmatpush3.msra.mxu0 %v452_v24  ;;  %v441_v59 = vld [vmem:[#allocation2 + $0x78] sm:$0xff]  ;;  %v442_v60 = vld [vmem:[#allocation2 + $0x28] sm:$0xff]  ;;  %v784_v62 = vld [vmem:[%s2079_s1 + $0x60] sm:$0xff] }
  0x4a   : > { %1385 = vmatprep.subr.mxu0 %v451_v27  ;;  %v785_v61 = vld [vmem:[%s2079_s1 + $0x68] sm:$0xff]  ;;  %v787_v63 = vld [vmem:[%s2079_s1 + $0x78] sm:$0xff]  ;;  %v786_v0 = vld [vmem:[%s2079_s1 + $0x70] sm:$0xff] }
  0x4b   : > { %1386 = vmatpush3.msra.mxu0 %v451_v27  ;;  %825 = vperm.xlu1 %1525, %v779_v36   ;;  %v885_v1 = vld [vmem:[%s2080_s2 + $0x8] sm:$0xff]  ;;  %v884_v2 = vld [vmem:[%s2080_s2] sm:$0xff]  ;;  %v887_v3 = vld [vmem:[%s2080_s2 + $0x18] sm:$0xff] }
  0x4c   : > { %1387 = vmatprep.subr.mxu0 %v450_v30  ;;  %820 = vperm.xlu0 %1524, %v778_v37   ;;  %v886_v4 = vld [vmem:[%s2080_s2 + $0x10] sm:$0xff]  ;;  %v889_v5 = vld [vmem:[%s2080_s2 + $0x28] sm:$0xff]  ;;  %v888_v6 = vld [vmem:[%s2080_s2 + $0x20] sm:$0xff] }
  0x4d   : > { %1388 = vmatpush3.msra.mxu0 %v450_v30  ;;  %v891_v7 = vld [vmem:[%s2080_s2 + $0x38] sm:$0xff]  ;;  %v890_v8 = vld [vmem:[%s2080_s2 + $0x30] sm:$0xff]  ;;  %v893_v9 = vld [vmem:[%s2080_s2 + $0x48] sm:$0xff] }
  0x4e   : > { %1389 = vmatprep.subr.mxu0 %v449_v31  ;;  %v892_v10 = vld [vmem:[%s2080_s2 + $0x40] sm:$0xff]  ;;  %v895_v11 = vld [vmem:[%s2080_s2 + $0x58] sm:$0xff]  ;;  %v894_v12 = vld [vmem:[%s2080_s2 + $0x50] sm:$0xff] }
  0x4f   : > { %1390 = vmatpush3.msra.mxu0 %v449_v31  ;;  %835 = vperm.xlu1 %1525, %v781_v40   ;;  %v897_v13 = vld [vmem:[%s2080_s2 + $0x68] sm:$0xff]  ;;  %v896_v14 = vld [vmem:[%s2080_s2 + $0x60] sm:$0xff]  ;;  %v899_v15 = vld [vmem:[%s2080_s2 + $0x78] sm:$0xff] }
  0x50   : > { %1391 = vmatprep.subr.mxu0 %v448_v34  ;;  %830 = vperm.xlu0 %1524, %v780_v41   ;;  %v898_v16 = vld [vmem:[%s2080_s2 + $0x70] sm:$0xff]  ;;  %v1020_v17 = vld [vmem:[%s2081_s3 + $0x8] sm:$0xff]  ;;  %v1019_v18 = vld [vmem:[%s2081_s3] sm:$0xff] }
  0x51   : > { %1392 = vmatpush3.msra.mxu0 %v448_v34  ;;  %v1022_v19 = vld [vmem:[%s2081_s3 + $0x18] sm:$0xff]  ;;  %v1021_v20 = vld [vmem:[%s2081_s3 + $0x10] sm:$0xff]  ;;  %v1024_v21 = vld [vmem:[%s2081_s3 + $0x28] sm:$0xff] }
  0x52   : > { %1393 = vmatprep.subr.mxu0 %v447_v35  ;;  %v1023_v22 = vld [vmem:[%s2081_s3 + $0x20] sm:$0xff]  ;;  %v1026_v23 = vld [vmem:[%s2081_s3 + $0x38] sm:$0xff]  ;;  %v1025_v24 = vld [vmem:[%s2081_s3 + $0x30] sm:$0xff] }
  0x53   : > { %1394 = vmatpush3.msra.mxu0 %v447_v35  ;;  %845 = vperm.xlu1 %1525, %v783_v44   ;;  %v1028_v25 = vld [vmem:[%s2081_s3 + $0x48] sm:$0xff]  ;;  %v1027_v26 = vld [vmem:[%s2081_s3 + $0x40] sm:$0xff]  ;;  %v1030_v28 = vld [vmem:[%s2081_s3 + $0x58] sm:$0xff] }
  0x54   : > { %1395 = vmatprep.subr.mxu0 %v446_v38  ;;  %840 = vperm.xlu0 %1524, %v782_v45   ;;  %v611_v27 = vld [vmem:[#allocation3] sm:$0xff]  ;;  %v1029_v29 = vld [vmem:[%s2081_s3 + $0x50] sm:$0xff]  ;;  %v1032_v30 = vld [vmem:[%s2081_s3 + $0x68] sm:$0xff] }
  0x55   : > { %1396 = vmatpush3.msra.mxu0 %v446_v38  ;;  %1459 = vmatprep.mubr.f32.mxu1 %v611_v27  ;;  %v1031_v31 = vld [vmem:[%s2081_s3 + $0x60] sm:$0xff]  ;;  %v1034_v32 = vld [vmem:[%s2081_s3 + $0x78] sm:$0xff]  ;;  %v1033_v33 = vld [vmem:[%s2081_s3 + $0x70] sm:$0xff] }
  0x56   : > { %1397 = vmatprep.subr.mxu0 %v445_v39 }
  0x57   : > { %1398 = vmatpush3.msra.mxu0 %v445_v39  ;;  %855 = vperm.xlu1 %1525, %v785_v61  }
  0x58   : > { %1399 = vmatprep.subr.mxu0 %v444_v42  ;;  %850 = vperm.xlu0 %1524, %v784_v62  }
  0x59   : > { %1400 = vmatpush3.msra.mxu0 %v444_v42 }
  0x5a   : > { %1401 = vmatprep.subr.mxu0 %v443_v43 }
  0x5b   : > { %1402 = vmatpush3.msra.mxu0 %v443_v43  ;;  %865 = vperm.xlu1 %1525, %v787_v63  }
  0x5c   : > { %1404 = vmatmul.mubr.f32.vlgmr.msra.gmra.mxu0 %v428_v46  ;;  %860 = vperm.xlu0 %1524, %v786_v0  }
  0x5d   : > { %1406 = vmatprep.mubr.f32.mxu0 %v429_v47 }
  0x5f   : > { %908 = vperm.xlu1 %1525, %v885_v1  }
  0x60   : > { %1407 = vmatmul.mubr.f32.gmra.mxu0 %v430_v48  ;;  %903 = vperm.xlu0 %1524, %v884_v2   ;;  %v1298_v48 = vld [vmem:[%s384_s29] ss:$0 sm:$0xff] }
  0x61   : > { %1409 = vmatprep.mubr.f32.mxu0 %v431_v49 }
  0x63   : > { %918 = vperm.xlu1 %1525, %v887_v3   ;;  %v612_v3 = vld [vmem:[#allocation3 + $0x8] sm:$0xff] }
  0x64   : > { %1410 = vmatmul.mubr.f32.gmra.mxu0 %v432_v50  ;;  %913 = vperm.xlu0 %1524, %v886_v4   ;;  %v613_v4 = vld [vmem:[#allocation3 + $0x10] sm:$0xff] }
  0x65   : > { %1412 = vmatprep.mubr.f32.mxu0 %v433_v51 }
  0x67   : > { %928 = vperm.xlu1 %1525, %v889_v5   ;;  %v614_v5 = vld [vmem:[#allocation3 + $0x18] sm:$0xff] }
  0x68   : > { %1413 = vmatmul.mubr.f32.gmra.mxu0 %v434_v52  ;;  %923 = vperm.xlu0 %1524, %v888_v6   ;;  %v615_v6 = vld [vmem:[#allocation3 + $0x20] sm:$0xff] }
  0x69   : > { %1415 = vmatprep.mubr.f32.mxu0 %v435_v53 }
  0x6b   : > { %938 = vperm.xlu1 %1525, %v891_v7   ;;  %v616_v7 = vld [vmem:[#allocation3 + $0x28] sm:$0xff] }
  0x6c   : > { %1416 = vmatmul.mubr.f32.gmra.mxu0 %v436_v54  ;;  %933 = vperm.xlu0 %1524, %v890_v8   ;;  %v617_v8 = vld [vmem:[#allocation3 + $0x30] sm:$0xff] }
  0x6d   : > { %1418 = vmatprep.mubr.f32.mxu0 %v437_v55 }
  0x6f   : > { %948 = vperm.xlu1 %1525, %v893_v9   ;;  %v618_v9 = vld [vmem:[#allocation3 + $0x38] sm:$0xff] }
  0x70   : > { %1419 = vmatmul.mubr.f32.gmra.mxu0 %v438_v56  ;;  %943 = vperm.xlu0 %1524, %v892_v10   ;;  %v619_v10 = vld [vmem:[#allocation3 + $0x40] sm:$0xff] }
  0x71   : > { %1421 = vmatprep.mubr.f32.mxu0 %v439_v57 }
  0x73   : > { %958 = vperm.xlu1 %1525, %v895_v11   ;;  %v620_v11 = vld [vmem:[#allocation3 + $0x48] sm:$0xff] }
  0x74   : > { %1422 = vmatmul.mubr.f32.gmra.mxu0 %v440_v58  ;;  %953 = vperm.xlu0 %1524, %v894_v12   ;;  %v621_v12 = vld [vmem:[#allocation3 + $0x50] sm:$0xff] }
  0x75   : > { %1424 = vmatprep.mubr.f32.mxu0 %v441_v59 }
  0x77   : > { %968 = vperm.xlu1 %1525, %v897_v13   ;;  %v622_v13 = vld [vmem:[#allocation3 + $0x58] sm:$0xff] }
  0x78   : > { %1425 = vmatmul.mubr.f32.gmra.mxu0 %v442_v60  ;;  %963 = vperm.xlu0 %1524, %v896_v14   ;;  %v623_v14 = vld [vmem:[#allocation3 + $0x60] sm:$0xff] }
  0x7b   : > { %978 = vperm.xlu1 %1525, %v899_v15   ;;  %v624_v15 = vld [vmem:[#allocation3 + $0x68] sm:$0xff] }
  0x7c   : > { %973 = vperm.xlu0 %1524, %v898_v16   ;;  %v625_v16 = vld [vmem:[#allocation3 + $0x70] sm:$0xff] }
  0x7f   : > { %1043 = vperm.xlu1 %1525, %v1020_v17   ;;  %v626_v17 = vld [vmem:[#allocation3 + $0x78] sm:$0xff] }
  0x80   : > { %1038 = vperm.xlu0 %1524, %v1019_v18  }
  0x83   : > { %1053 = vperm.xlu1 %1525, %v1022_v19  }
  0x84   : > { %1048 = vperm.xlu0 %1524, %v1021_v20  }
  0x87   : > { %1063 = vperm.xlu1 %1525, %v1024_v21  }
  0x88   : > { %1058 = vperm.xlu0 %1524, %v1023_v22  }
  0x8b   : > { %1073 = vperm.xlu1 %1525, %v1026_v23  }
  0x8c   : > { %1068 = vperm.xlu0 %1524, %v1025_v24  }
  0x8f   : > { %1083 = vperm.xlu1 %1525, %v1028_v25  }
  0x90   : > { %1078 = vperm.xlu0 %1524, %v1027_v26  }
  0x93   : > { %1093 = vperm.xlu1 %1525, %v1030_v28  }
  0x94   : > { %1088 = vperm.xlu0 %1524, %v1029_v29  }
  0x97   : > { %1103 = vperm.xlu1 %1525, %v1032_v30  }
  0x98   : > { %1098 = vperm.xlu0 %1524, %v1031_v31  }
  0x9b   : > { %1113 = vperm.xlu1 %1525, %v1034_v32  }
  0x9c   : > { %1108 = vperm.xlu0 %1524, %v1033_v33  }
  0xba   : > { %v801_v18 = vpop.permute.xlu1 %800 }
  0xbb   : > { %v791_v19 = vpop.permute.xlu0 %790 }
  0xbe   : > { %v806_v20 = vpop.permute.xlu1 %805 }
  0xbf   : > { %v796_v21 = vpop.permute.xlu0 %795 }
  0xc2   : > { %v1921_v22 = vpop.permute.xlu1 %815 }
  0xc3   : > { %v1923_v23 = vpop.permute.xlu0 %810 }
  0xc6   : > { %v1925_v24 = vpop.permute.xlu1 %825 }
  0xc7   : > { %v1927_v25 = vpop.permute.xlu0 %820 }
  0xca   : > { %v1929_v26 = vpop.permute.xlu1 %835 }
  0xcb   : > { %v1931_v27 = vpop.permute.xlu0 %830 }
  0xce   : > { %v1933_v28 = vpop.permute.xlu1 %845 }
  0xcf   : > { %v1935_v29 = vpop.permute.xlu0 %840 }
  0xd2   : > { %v1937_v30 = vpop.permute.xlu1 %855 }
  0xd3   : > { %v1939_v31 = vpop.permute.xlu0 %850 }
  0xd6   : > { %v1941_v32 = vpop.permute.xlu1 %865 }
  0xd7   : > { %v1943_v33 = vpop.permute.xlu0 %860 }
 0x11c   : > { %v1405_v34 = vpop.f32.mrf.mxu0 }
 0x11d   : > { %v538_v1 = vadd.f32 %v1405_v34, %v1298_v48  ;;  %v909_v34 = vpop.permute.xlu1 %908 }
 0x11e   : > { %v532_v35 = vpop.f32.mrf.mxu0 }
 0x11f   : > { %v533_v2 = vadd.f32 %v1298_v48, %v532_v35  ;;  %v904_v35 = vpop.permute.xlu0 %903 }
 0x120   : > { %v1408_v36 = vpop.f32.mrf.mxu0 }
 0x121   : > { %v548_v63 = vadd.f32 %v1408_v36, %v1298_v48  ;;  %v919_v36 = vpop.permute.xlu1 %918 }
 0x122   : > { %v542_v37 = vpop.f32.mrf.mxu0 }
 0x123   : > { %v543_v0 = vadd.f32 %v1298_v48, %v542_v37  ;;  %v914_v37 = vpop.permute.xlu0 %913 }
 0x124   : > { %v1411_v38 = vpop.f32.mrf.mxu0 }
 0x125   : > { %v558_v61 = vadd.f32 %v1411_v38, %v1298_v48  ;;  %v929_v38 = vpop.permute.xlu1 %928 }
 0x126   : > { %v552_v39 = vpop.f32.mrf.mxu0 }
 0x127   : > { %v553_v62 = vadd.f32 %v1298_v48, %v552_v39  ;;  %v924_v39 = vpop.permute.xlu0 %923 }
 0x128   : > { %v1414_v40 = vpop.f32.mrf.mxu0 }
 0x129   : > { %v568_v59 = vadd.f32 %v1414_v40, %v1298_v48  ;;  %v939_v40 = vpop.permute.xlu1 %938 }
 0x12a   : > { %v562_v41 = vpop.f32.mrf.mxu0 }
 0x12b   : > { %v563_v60 = vadd.f32 %v1298_v48, %v562_v41  ;;  %v1945_v41 = vpop.permute.xlu0 %933 }
 0x12c   : > { %v1417_v42 = vpop.f32.mrf.mxu0 }
 0x12d   : > { %v578_v57 = vadd.f32 %v1417_v42, %v1298_v48  ;;  %v1947_v42 = vpop.permute.xlu1 %948 }
 0x12e   : > { %v572_v43 = vpop.f32.mrf.mxu0 }
 0x12f   : > { %v573_v58 = vadd.f32 %v1298_v48, %v572_v43  ;;  %v1949_v43 = vpop.permute.xlu0 %943 }
 0x130   : > { %v1420_v44 = vpop.f32.mrf.mxu0 }
 0x131   : > { %v588_v55 = vadd.f32 %v1420_v44, %v1298_v48  ;;  %v1951_v44 = vpop.permute.xlu1 %958 }
 0x132   : > { %v582_v45 = vpop.f32.mrf.mxu0 }
 0x133   : > { %v583_v56 = vadd.f32 %v1298_v48, %v582_v45  ;;  %v1953_v45 = vpop.permute.xlu0 %953 }
 0x134   : > { %v1423_v46 = vpop.f32.mrf.mxu0 }
 0x135   : > { %v598_v53 = vadd.f32 %v1423_v46, %v1298_v48  ;;  %v1955_v46 = vpop.permute.xlu1 %968 }
 0x136   : > { %v592_v47 = vpop.f32.mrf.mxu0 }
 0x137   : > { %v593_v54 = vadd.f32 %v1298_v48, %v592_v47  ;;  %v1957_v47 = vpop.permute.xlu0 %963 }
 0x138   : > { %v1426_v49 = vpop.f32.mrf.mxu0 }
 0x139   : > { %v608_v50 = vadd.f32 %v1426_v49, %v1298_v48 }
 0x13a   : > { %v602_v51 = vpop.f32.mrf.mxu0 }
 0x13b   : > { %v603_v52 = vadd.f32 %v1298_v48, %v602_v51  ;;  %1427 = vmatprep.subr.mxu1 %v608_v50  ;;  %v1959_v48 = vpop.permute.xlu1 %978  ;;  %v1961_v49 = vpop.permute.xlu0 %973 }
 0x13c   : > { %1428 = vmatpush3.msra.mxu1 %v608_v50 }
 0x13d   : > { %1429 = vmatprep.subr.mxu1 %v603_v52 }
 0x13e   : > { %1430 = vmatpush3.msra.mxu1 %v603_v52 }
 0x13f   : > { %1431 = vmatprep.subr.mxu1 %v598_v53  ;;  %v1044_v50 = vpop.permute.xlu1 %1043  ;;  %v1039_v51 = vpop.permute.xlu0 %1038 }
 0x140   : > { %1432 = vmatpush3.msra.mxu1 %v598_v53 }
 0x141   : > { %1433 = vmatprep.subr.mxu1 %v593_v54 }
 0x142   : > { %1434 = vmatpush3.msra.mxu1 %v593_v54  ;;  %v1968_v54 = vld [vmem:[%s387_s16] ss:$0 sm:$0xff] }
 0x143   : > { %1435 = vmatprep.subr.mxu1 %v588_v55  ;;  %v1054_v52 = vpop.permute.xlu1 %1053  ;;  %v1049_v53 = vpop.permute.xlu0 %1048 }
 0x144   : > { %1436 = vmatpush3.msra.mxu1 %v588_v55 }
 0x145   : > { %1437 = vmatprep.subr.mxu1 %v583_v56 }
 0x146   : > { %1438 = vmatpush3.msra.mxu1 %v583_v56  ;;  %v1975_v56 = vld [vmem:[%s390_s19] ss:$0 sm:$0xff] }
 0x147   : > { %1439 = vmatprep.subr.mxu1 %v578_v57  ;;  %v1064_v55 = vpop.permute.xlu1 %1063 }
 0x148   : > { %1440 = vmatpush3.msra.mxu1 %v578_v57  ;;  %v1059_v57 = vpop.permute.xlu0 %1058 }
 0x149   : > { %1441 = vmatprep.subr.mxu1 %v573_v58 }
 0x14a   : > { %1442 = vmatpush3.msra.mxu1 %v573_v58 }
 0x14b   : > { %1443 = vmatprep.subr.mxu1 %v568_v59 }
 0x14c   : > { %1444 = vmatpush3.msra.mxu1 %v568_v59  ;;  %v988_v59 = vmul.f32 %v1968_v54, %v909_v34 }
 0x14d   : > { %1445 = vmatprep.subr.mxu1 %v563_v60 }
 0x14e   : > { %1446 = vmatpush3.msra.mxu1 %v563_v60 }
 0x14f   : > { %1447 = vmatprep.subr.mxu1 %v558_v61 }
 0x150   : > { %1448 = vmatpush3.msra.mxu1 %v558_v61 }
 0x151   : > { %1449 = vmatprep.subr.mxu1 %v553_v62 }
 0x152   : > { %1450 = vmatpush3.msra.mxu1 %v553_v62  ;;  %v987_v62 = vmul.f32 %v1968_v54, %v904_v35  ;;  %v991_v35 = vmul.f32 %v1968_v54, %v924_v39 }
 0x153   : > { %1451 = vmatprep.subr.mxu1 %v548_v63 }
 0x154   : > { %1452 = vmatpush3.msra.mxu1 %v548_v63  ;;  %v1123_v63 = vmul.f32 %v1975_v56, %v1044_v50  ;;  %v1127_v50 = vmul.f32 %v1975_v56, %v1064_v55 }
 0x155   : > { %1453 = vmatprep.subr.mxu1 %v543_v0 }
 0x156   : > { %1454 = vmatpush3.msra.mxu1 %v543_v0 }
 0x157   : > { %1455 = vmatprep.subr.mxu1 %v538_v1 }
 0x158   : > { %1456 = vmatpush3.msra.mxu1 %v538_v1 }
 0x159   : > { %1457 = vmatprep.subr.mxu1 %v533_v2 }
 0x15a   : > { %1458 = vmatpush3.msra.mxu1 %v533_v2  ;;  %v990_v2 = vmul.f32 %v1968_v54, %v919_v36 }
 0x15b   : > { %1460 = vmatmul.mubr.f32.vlgmr.msra.gmra.mxu1 %v612_v3  ;;  %v1074_v3 = vpop.permute.xlu1 %1073 }
 0x15c   : > { %1462 = vmatprep.mubr.f32.mxu1 %v613_v4 }
 0x15f   : > { %1463 = vmatmul.mubr.f32.gmra.mxu1 %v614_v5  ;;  %v1122_v5 = vmul.f32 %v1975_v56, %v1039_v51  ;;  %v1084_v36 = vpop.permute.xlu1 %1083 }
 0x160   : > { %1465 = vmatprep.mubr.f32.mxu1 %v615_v6 }
 0x163   : > { %1466 = vmatmul.mubr.f32.gmra.mxu1 %v616_v7 }
 0x164   : > { %1468 = vmatprep.mubr.f32.mxu1 %v617_v8 }
 0x167   : > { %1469 = vmatmul.mubr.f32.gmra.mxu1 %v618_v9  ;;  %v989_v9 = vmul.f32 %v1968_v54, %v914_v37 }
 0x168   : > { %1471 = vmatprep.mubr.f32.mxu1 %v619_v10  ;;  %v1069_v10 = vpop.permute.xlu0 %1068 }
 0x16b   : > { %1472 = vmatmul.mubr.f32.gmra.mxu1 %v620_v11 }
 0x16c   : > { %1474 = vmatprep.mubr.f32.mxu1 %v621_v12  ;;  %v1125_v12 = vmul.f32 %v1975_v56, %v1054_v52  ;;  %v994_v52 = vmul.f32 %v1968_v54, %v939_v40 }
 0x16f   : > { %1475 = vmatmul.mubr.f32.gmra.mxu1 %v622_v13 }
 0x170   : > { %1477 = vmatprep.mubr.f32.mxu1 %v623_v14 }
 0x173   : > { %1478 = vmatmul.mubr.f32.gmra.mxu1 %v624_v15 }
 0x174   : > { %1480 = vmatprep.mubr.f32.mxu1 %v625_v16  ;;  %v992_v16 = vmul.f32 %v1968_v54, %v929_v38 }
 0x177   : > { %1481 = vmatmul.mubr.f32.gmra.mxu1 %v626_v17 }
 0x21b   : > { %v1461_v58 = vpop.f32.mrf.mxu1 }
 0x21c   : > { %v869_v60 = vmul.f32 %v1461_v58, %v796_v21 }
 0x21d   : > { %v693_v61 = vpop.f32.mrf.mxu1 }
 0x21e   : > { %v1004_v0 = vadd.f32 %v988_v59, %v869_v60  ;;  %v868_v1 = vmul.f32 %v791_v19, %v693_v61  ;;  %v1124_v19 = vmul.f32 %v1975_v56, %v1049_v53  ;;  %v1079_v53 = vpop.permute.xlu0 %1078  ;;  %v1126_v59 = vmul.f32 %v1975_v56, %v1059_v57 }
 0x21f   : > { %v1464_v4 = vpop.f32.mrf.mxu1  ;;  %v993_v60 = vmul.f32 %v1968_v54, %v1945_v41 }
 0x220   : > { %v1982_v6 = vadd.f32 %v1123_v63, %v1004_v0  ;;  %v1003_v7 = vadd.f32 %v987_v62, %v868_v1  ;;  %v871_v8 = vmul.f32 %v1464_v4, %v806_v20  ;;  %v1129_v62 = vmul.f32 %v1975_v56, %v1074_v3  ;;  %v1094_v0 = vpop.permute.xlu1 %1093 }
 0x221   : > { %v703_v11 = vpop.f32.mrf.mxu1  ;;  %v996_v63 = vmul.f32 %v1968_v54, %v1947_v42  ;;  %v995_v4 = vmul.f32 %v1968_v54, %v1949_v43 }
 0x222   : > { %1155 = vst [vmem:[#allocation2] sm:$0xff] %v1982_v6  ;;  %v1987_v13 = vadd.f32 %v1122_v5, %v1003_v7  ;;  %v1006_v14 = vadd.f32 %v990_v2, %v871_v8  ;;  %v870_v15 = vmul.f32 %v801_v18, %v703_v11  ;;  %v1089_v5 = vpop.permute.xlu0 %1088 }
 0x223   : > { %v1467_v17 = vpop.f32.mrf.mxu1 }
 0x224   : > { %1154 = vst [vmem:[#allocation2 + $0x30] sm:$0xff] %v1987_v13  ;;  %v1992_v20 = vadd.f32 %v1125_v12, %v1006_v14  ;;  %v1005_v21 = vadd.f32 %v989_v9, %v870_v15  ;;  %v873_v34 = vmul.f32 %v1467_v17, %v1921_v22  ;;  %v997_v15 = vmul.f32 %v1968_v54, %v1953_v45 }
 0x225   : > { %v713_v37 = vpop.f32.mrf.mxu1 }
 0x226   : > { %1157 = vst [vmem:[#allocation2 + $0x18] sm:$0xff] %v1992_v20  ;;  %v1998_v18 = vadd.f32 %v1124_v19, %v1005_v21  ;;  %v1008_v38 = vadd.f32 %v992_v16, %v873_v34  ;;  %v872_v51 = vmul.f32 %v1923_v23, %v713_v37  ;;  %v1104_v16 = vpop.permute.xlu1 %1103  ;;  %v1133_v19 = vmul.f32 %v1975_v56, %v1094_v0 }
 0x227   : > { %v1470_v58 = vpop.f32.mrf.mxu1  ;;  %v1000_v34 = vmul.f32 %v1968_v54, %v1955_v46  ;;  %v1132_v37 = vmul.f32 %v1975_v56, %v1089_v5 }
 0x228   : > { %1156 = vst [vmem:[#allocation2 + $0x58] sm:$0xff] %v1998_v18  ;;  %v2004_v22 = vadd.f32 %v1127_v50, %v1008_v38  ;;  %v1007_v39 = vadd.f32 %v991_v35, %v872_v51  ;;  %v875_v55 = vmul.f32 %v1470_v58, %v1925_v24  ;;  %v1128_v24 = vmul.f32 %v1975_v56, %v1069_v10  ;;  %v1099_v35 = vpop.permute.xlu0 %1098 }
 0x229   : > { %v723_v61 = vpop.f32.mrf.mxu1  ;;  %v998_v10 = vmul.f32 %v1968_v54, %v1951_v44  ;;  %v999_v38 = vmul.f32 %v1968_v54, %v1957_v47  ;;  %v1002_v58 = vmul.f32 %v1968_v54, %v1959_v48 }
 0x22a   : > { %1159 = vst [vmem:[#allocation2 + $0x68] sm:$0xff] %v2004_v22  ;;  %v2011_v23 = vadd.f32 %v1126_v59, %v1007_v39  ;;  %v1010_v40 = vadd.f32 %v994_v52, %v875_v55  ;;  %v874_v57 = vmul.f32 %v1927_v25, %v723_v61  ;;  %v1131_v25 = vmul.f32 %v1975_v56, %v1084_v36  ;;  %v1114_v59 = vpop.permute.xlu1 %1113 }
 0x22b   : > { %v1473_v1 = vpop.f32.mrf.mxu1  ;;  %v1135_v52 = vmul.f32 %v1975_v56, %v1104_v16  ;;  %v1134_v55 = vmul.f32 %v1975_v56, %v1099_v35  ;;  %v1001_v61 = vmul.f32 %v1968_v54, %v1961_v49 }
 0x22c   : > { %1158 = vst [vmem:[#allocation2 + $0x50] sm:$0xff] %v2011_v23  ;;  %v2018_v41 = vadd.f32 %v1129_v62, %v1010_v40  ;;  %v1009_v2 = vadd.f32 %v993_v60, %v874_v57  ;;  %v877_v3 = vmul.f32 %v1473_v1, %v1929_v26  ;;  %v1130_v26 = vmul.f32 %v1975_v56, %v1079_v53  ;;  %v1109_v62 = vpop.permute.xlu0 %1108 }
 0x22d   : > { %v733_v7 = vpop.f32.mrf.mxu1  ;;  %v1137_v57 = vmul.f32 %v1975_v56, %v1114_v59  ;;  %v1136_v0 = vmul.f32 %v1975_v56, %v1109_v62 }
 0x22e   : > { %1161 = vst [vmem:[#allocation2 + $0x48] sm:$0xff] %v2018_v41  ;;  %v2025_v42 = vadd.f32 %v1128_v24, %v1009_v2  ;;  %v1012_v8 = vadd.f32 %v996_v63, %v877_v3  ;;  %v876_v9 = vmul.f32 %v1931_v27, %v733_v7 }
 0x22f   : > { %v1476_v11 = vpop.f32.mrf.mxu1 }
 0x230   : > { %1160 = vst [vmem:[#allocation2 + $0x8] sm:$0xff] %v2025_v42  ;;  %v1147_v43 = vadd.f32 %v1131_v25, %v1012_v8  ;;  %v1011_v12 = vadd.f32 %v995_v4, %v876_v9  ;;  %v879_v14 = vmul.f32 %v1476_v11, %v1933_v28 }
 0x231   : > { %v743_v17 = vpop.f32.mrf.mxu1 }
 0x232   : > { %1163 = vst [vmem:[#allocation2 + $0x20] sm:$0xff] %v1147_v43  ;;  %v1146_v27 = vadd.f32 %v1130_v26, %v1011_v12  ;;  %v1014_v21 = vadd.f32 %v998_v10, %v879_v14  ;;  %v878_v44 = vmul.f32 %v1935_v29, %v743_v17 }
 0x233   : > { %v1479_v36 = vpop.f32.mrf.mxu1 }
 0x234   : > { %1162 = vst [vmem:[#allocation2 + $0x40] sm:$0xff] %v1146_v27  ;;  %v1149_v28 = vadd.f32 %v1133_v19, %v1014_v21  ;;  %v1013_v50 = vadd.f32 %v997_v15, %v878_v44  ;;  %v881_v45 = vmul.f32 %v1479_v36, %v1937_v30 }
 0x235   : > { %v753_v51 = vpop.f32.mrf.mxu1 }
 0x236   : > { %1165 = vst [vmem:[#allocation2 + $0x38] sm:$0xff] %v1149_v28  ;;  %v1148_v29 = vadd.f32 %v1132_v37, %v1013_v50  ;;  %v1016_v53 = vadd.f32 %v1000_v34, %v881_v45  ;;  %v880_v46 = vmul.f32 %v1939_v31, %v753_v51 }
 0x237   : > { %v1482_v39 = vpop.f32.mrf.mxu1 }
 0x238   : > { %1164 = vst [vmem:[#allocation2 + $0x10] sm:$0xff] %v1148_v29  ;;  %v1151_v30 = vadd.f32 %v1135_v52, %v1016_v53  ;;  %v1015_v60 = vadd.f32 %v999_v38, %v880_v46  ;;  %v883_v47 = vmul.f32 %v1482_v39, %v1941_v32 }
 0x239   : > { %v763_v40 = vpop.f32.mrf.mxu1 }
 0x23a   : > { %1167 = vst [vmem:[#allocation2 + $0x70] sm:$0xff] %v1151_v30  ;;  %v1150_v31 = vadd.f32 %v1134_v55, %v1015_v60  ;;  %v1018_v63 = vadd.f32 %v1002_v58, %v883_v47  ;;  %v882_v48 = vmul.f32 %v1943_v33, %v763_v40 }
 0x23c   : > { %1166 = vst [vmem:[#allocation2 + $0x60] sm:$0xff] %v1150_v31  ;;  %v1153_v1 = vadd.f32 %v1137_v57, %v1018_v63  ;;  %v1017_v24 = vadd.f32 %v1001_v61, %v882_v48  ;;  %1173 = sbr.rel (%p1301_p4) target bundleno = 585 (0x249), region = 72 }
 0x23e   : > { %1169 = vst [vmem:[#allocation2 + $0x28] sm:$0xff] %v1153_v1  ;;  %v1152_v2 = vadd.f32 %v1136_v0, %v1017_v24 }
 0x240   : > { %1168 = vst [vmem:[#allocation2 + $0x78] sm:$0xff] %v1152_v2 }
 0x241   : > { %1174 = vst [vmem:[#allocation8] sm:$0xff] %v1987_v13  ;;  %1175 = vst [vmem:[#allocation8 + $0x8] sm:$0xff] %v1982_v6 }
 0x242   : > { %1176 = vst [vmem:[#allocation8 + $0x10] sm:$0xff] %v1998_v18  ;;  %1177 = vst [vmem:[#allocation8 + $0x18] sm:$0xff] %v1992_v20 }
 0x243   : > { %1178 = vst [vmem:[#allocation8 + $0x20] sm:$0xff] %v2011_v23  ;;  %1179 = vst [vmem:[#allocation8 + $0x28] sm:$0xff] %v2004_v22 }
 0x244   : > { %1180 = vst [vmem:[#allocation8 + $0x30] sm:$0xff] %v2025_v42  ;;  %1181 = vst [vmem:[#allocation8 + $0x38] sm:$0xff] %v2018_v41 }
 0x245   : > { %1182 = vst [vmem:[#allocation8 + $0x40] sm:$0xff] %v1146_v27  ;;  %1183 = vst [vmem:[#allocation8 + $0x48] sm:$0xff] %v1147_v43 }
 0x246   : > { %1184 = vst [vmem:[#allocation8 + $0x50] sm:$0xff] %v1148_v29  ;;  %1185 = vst [vmem:[#allocation8 + $0x58] sm:$0xff] %v1149_v28 }
 0x247   : > { %1186 = vst [vmem:[#allocation8 + $0x60] sm:$0xff] %v1150_v31  ;;  %1187 = vst [vmem:[#allocation8 + $0x68] sm:$0xff] %v1151_v30 }
 0x248   : > { %1188 = vst [vmem:[#allocation8 + $0x70] sm:$0xff] %v1152_v2  ;;  %1189 = vst [vmem:[#allocation8 + $0x78] sm:$0xff] %v1153_v1 }
 0x249 PF: > { %p1506_p6 = scmp.eq.s32.totalorder %s1686_s10, 2  ;;  %s1627_s25 = smov [#allocation8]  }
 0x24a   : > { %s1196_s16 = sshll.u32 %s1627_s25, 4  ;;  %s1197_s16 = int_to_ptr.vmem [resolvable:$true] %s1196_s16 }
 0x24b   : > { %s1578_s19 = scalar_lea.vmem %s1197_s16, 2048  ;;  %p1585_p0 = scmp.lt.s32.totalorder %s1197_s16, %s1197_s16 }
 0x24c   : > { %p1579_p7 = scmp.ne.s32.totalorder %s1197_s16, %s1578_s19  ;;  %p1586_p1 = scmp.lt.s32.totalorder %s1578_s19, %s1578_s19 }
 0x24e   : > { %p1580_p12 = pnand %p1579_p7, %p1506_p6  ;;  %p1587_p5 = por %p1586_p1, %p1585_p0 }
 0x250   : > { %p1581_p13 = pneg %p1580_p12 }
 0x252   : > { %p1588_p8 = pnand %p1587_p5, %p1581_p13 }
 0x254   : > { %1591 = shalt.err (!%p1588_p8)
}
 0x255   : > { %s1628_s15 = smov 128   ;;  %s1629_s17 = smov 8  }
 0x256   : > { %1492 = dma.vmem_to_hbm [thread:$0]  (%p1506_p6), %s1197_s16, 2048, %s2087_s9, [#allocation5], %s1628_s15, %s1628_s15, %s1629_s17  }
 0x257   : > { %1615 = dma.done.wait (%p1506_p6), [#allocation5], 2048  }
 0x258   : > { %1617 = vsyncadd (%p1506_p6), [#allocation5], 4294965248 }
 0x259 PF: > { %s22_s30 = sadd.s32 1, %s1620_s30  }
 0x25a   : > { %p19_p9 = scmp.ge.s32.totalorder %s22_s30, 5  }
 0x25c   :  { %21 = sbr.rel (!%p19_p9) target bundleno = 3 (0x3), region = 109 }
 0x261   :  { %1212 = vsyncpa [#allocation4], 1 }
 0x262   :  { %1214 = vsyncpa [#allocation4 + $0x1], 1 }
 0x263   :  { %1215 = vsyncpa [#allocation7], 1 }
 0x264   :  { %1216 = vsyncpa [#allocation5], 1 }
 0x265   :  { %1218 = vsyncpa [#allocation5 + $0x1], 1 }

</bundles_post_ra>
